<compile_context>
chip_gen: v5e
topology: v5e:2x2
jax: 0.10.0
libtpu: 0.0.40
codegen_flags: <defaults>
</compile_context>

<pallas_src>
import jax
import jax.numpy as jnp
from jax.experimental import pallas as pl
from jax.experimental.pallas import tpu as pltpu


def _round_up(x, m):
    return ((x + m - 1) // m) * m


def _autoencoder_kernel(x_ref,
                        w1_ref, b1_ref,    # Encoder Linear(D -> H)
                        w23_ref, b23_ref,  # folded Linear(H -> Z) @ Linear(Z -> H)
                        w4_ref, b4_ref,    # Decoder Linear(H -> D)
                        out_ref):
    # Cast to bf16 inside the kernel (VPU filler under the MXU; no extra HBM pass).
    x = x_ref[...].astype(jnp.bfloat16)                               # (TB, D)

    # Encoder first layer: Linear -> ReLU   (bf16 matmul, f32 accumulation)
    h = jnp.dot(x, w1_ref[...], preferred_element_type=jnp.float32) + b1_ref[...]
    h = jnp.maximum(h, 0.0).astype(jnp.bfloat16)                      # (TB, H)

    # Folded encoder-2nd + decoder-1st layers (no nonlinearity between them),
    # then the decoder ReLU.
    g = jnp.dot(h, w23_ref[...], preferred_element_type=jnp.float32) + b23_ref[...]
    g = jnp.maximum(g, 0.0).astype(jnp.bfloat16)                      # (TB, H)

    # Decoder last layer.
    y = jnp.dot(g, w4_ref[...], preferred_element_type=jnp.float32) + b4_ref[...]

    out_ref[...] = y.astype(out_ref.dtype)                            # (TB, D)


def autoencoder_forward(x, kernel_params, *, block_b=1024, out_dtype=jnp.float32):
    """Run the autoencoder forward pass.

    x:             (B, D) float32 (or bfloat16) activations.
    kernel_params: dict from fold_params() — bf16 weights (in, out), f32 biases.
    out_dtype:     float32 (module semantics) or bfloat16 (halved writeback BW).
    Returns (B, D) array of out_dtype.
    """
    B, D = x.shape
    w1, b1 = kernel_params["w1"], kernel_params["b1"]
    w23, b23 = kernel_params["w23"], kernel_params["b23"]
    w4, b4 = kernel_params["w4"], kernel_params["b4"]
    H = w1.shape[1]

    # --- batch tiling -------------------------------------------------------
    # tb: multiple of 16 (bf16 sublane packing), capped by block_b.  Irregular
    # batches are padded up to a tile multiple and the result is sliced back.
    block_b = _round_up(max(int(block_b), 16), 16)
    tb = min(block_b, _round_up(B, 16))
    B_pad = _round_up(B, tb)
    if B_pad != B:
        x = jnp.pad(x, ((0, B_pad - B), (0, 0)))
    grid = (B_pad // tb,)

    def resident_spec(a):
        # Full-extent block, constant block index: DMA'd once, VMEM-resident.
        return pl.BlockSpec(a.shape, lambda i, _nd=a.ndim: (0,) * _nd)

    # --- scheduling hints ---------------------------------------------------
    out_itemsize = jnp.dtype(out_dtype).itemsize
    weight_bytes = sum(int(a.size) * a.dtype.itemsize
                       for a in (w1, b1, w23, b23, w4, b4))
    flops = 2 * B_pad * (D * H + H * H + H * D)
    bytes_accessed = (B_pad * D * x.dtype.itemsize
                      + weight_bytes
                      + B_pad * D * out_itemsize)
    # Double-buffered x/out tiles + double-buffered resident weights + headroom
    # for in-body intermediates; keeps us inside v7x's 64 MiB when scaled up.
    vmem_limit = int(2 * tb * D * (x.dtype.itemsize + out_itemsize)
                     + 2 * weight_bytes
                     + (8 << 20))

    out = pl.pallas_call(
        _autoencoder_kernel,
        out_shape=jax.ShapeDtypeStruct((B_pad, D), out_dtype),
        grid=grid,
        in_specs=[
            pl.BlockSpec((tb, D), lambda i: (i, 0)),   # x: batch-tiled
            resident_spec(w1), resident_spec(b1),
            resident_spec(w23), resident_spec(b23),
            resident_spec(w4), resident_spec(b4),
        ],
        out_specs=pl.BlockSpec((tb, D), lambda i: (i, 0)),
        compiler_params=pltpu.CompilerParams(
            dimension_semantics=("parallel",),
            vmem_limit_bytes=vmem_limit),
        cost_estimate=pl.CostEstimate(
            flops=flops, transcendentals=0, bytes_accessed=bytes_accessed),
    )(x, w1, b1, w23, b23, w4, b4)

    return out[:B] if B_pad != B else out


def init_params(key, D, H, Z):
    """PyTorch-Linear-style init (uniform(-1/sqrt(fan_in), +1/sqrt(fan_in))).
    Returns the *module-level* f32 params: weights transposed to (in, out),
    biases shaped (1, out)."""
    def linear(key, fan_in, fan_out):
        kw, kb = jax.random.split(key)
        bound = 1.0 / (fan_in ** 0.5)
        w = jax.random.uniform(kw, (fan_in, fan_out), jnp.float32, -bound, bound)
        b = jax.random.uniform(kb, (1, fan_out), jnp.float32, -bound, bound)
        return w, b

    k1, k2, k3, k4 = jax.random.split(key, 4)
    w1, b1 = linear(k1, D, H)
    w2, b2 = linear(k2, H, Z)
    w3, b3 = linear(k3, Z, H)
    w4, b4 = linear(k4, H, D)
    return {"w1": w1, "b1": b1, "w2": w2, "b2": b2,
            "w3": w3, "b3": b3, "w4": w4, "b4": b4}


def fold_params(p):
    """Prepare kernel params: fold W2@W3 / b2@W3+b3 in f32 (valid because there
    is no nonlinearity between the encoder's last and the decoder's first
    Linear), then cast weights to bf16 (MXU-native); biases stay f32."""
    w23 = p["w2"] @ p["w3"]
    b23 = p["b2"] @ p["w3"] + p["b3"]
    return {
        "w1": p["w1"].astype(jnp.bfloat16), "b1": p["b1"],
        "w23": w23.astype(jnp.bfloat16), "b23": b23,
        "w4": p["w4"].astype(jnp.bfloat16), "b4": p["b4"],
    }


def reference_kernel_math(x, kp, out_dtype=jnp.float32):
    """Pure-JAX mirror of the kernel's exact recipe (bf16 in, f32 accumulate)."""
    xb = x.astype(jnp.bfloat16)
    h = jnp.maximum(
        jnp.dot(xb, kp["w1"], preferred_element_type=jnp.float32) + kp["b1"], 0.0
    ).astype(jnp.bfloat16)
    g = jnp.maximum(
        jnp.dot(h, kp["w23"], preferred_element_type=jnp.float32) + kp["b23"], 0.0
    ).astype(jnp.bfloat16)
    y = jnp.dot(g, kp["w4"], preferred_element_type=jnp.float32) + kp["b4"]
    return y.astype(out_dtype)


def reference_module(x, p):
    """Full-f32 module semantics (what the PyTorch AutoEncoder computes)."""
    h = jnp.maximum(x @ p["w1"] + p["b1"], 0.0)
    z = h @ p["w2"] + p["b2"]
    g = jnp.maximum(z @ p["w3"] + p["b3"], 0.0)
    return g @ p["w4"] + p["b4"]


if __name__ == "__main__":
    # Lane-dense feature dims (multiples of 128); modest batch for the demo.
    # Note for v6e/v7x: H=Z=128 fills only half the 256-wide MXU; if dims are
    # negotiable, choose multiples of 256 (perfect fit on v5e as-is).
    B, D, H, Z = 256, 256, 128, 128

    key = jax.random.PRNGKey(0)
    kx, kp = jax.random.split(key)
    x = jax.random.normal(kx, (B, D), dtype=jnp.float32)
    params = init_params(kp, D, H, Z)
    kparams = fold_params(params)

    out = autoencoder_forward(x, kparams)
    out = jax.block_until_ready(out)

    assert out.shape == (B, D)
    assert out.dtype == jnp.float32
    ref_k = reference_kernel_math(x, kparams)
    ref_m = reference_module(x, params)
    assert jnp.allclose(out, ref_k, atol=1e-2, rtol=1e-2), "mismatch vs kernel-math ref"
    assert jnp.allclose(out, ref_m, atol=5e-2, rtol=5e-2), "mismatch vs f32 module ref"

    # Irregular batch: exercises the pad-to-tile-multiple path (no tb=B blowup).
    B2 = 200
    x2 = jax.random.normal(jax.random.PRNGKey(1), (B2, D), dtype=jnp.float32)
    out2 = jax.block_until_ready(autoencoder_forward(x2, kparams))
    assert out2.shape == (B2, D)
    assert jnp.allclose(out2, reference_kernel_math(x2, kparams),
                        atol=1e-2, rtol=1e-2), "mismatch on padded batch"

    print("KERNEL_OK")
</pallas_src>

<mosaic_0001>
module attributes {stable_mosaic.version = 11 : i64} {
  func.func @_autoencoder_kernel(%arg0: i32, %arg1: memref<256x256xf32, #tpu.memory_space<vmem>>, %arg2: memref<256x128xbf16, #tpu.memory_space<vmem>>, %arg3: memref<1x128xf32, #tpu.memory_space<vmem>>, %arg4: memref<128x128xbf16, #tpu.memory_space<vmem>>, %arg5: memref<1x128xf32, #tpu.memory_space<vmem>>, %arg6: memref<128x256xbf16, #tpu.memory_space<vmem>>, %arg7: memref<1x256xf32, #tpu.memory_space<vmem>>, %arg8: memref<256x256xf32, #tpu.memory_space<vmem>>) attributes {dimension_semantics = [#tpu.dimension_semantics<parallel>], iteration_bounds = array<i64: 1>, scalar_prefetch = 0 : i64, scratch_operands = 0 : i64, tpu.core_type = #tpu.core_type<tc>, window_params = [{transform_indices = @transform_0, window_bounds = array<i64: 256, 256>}, {pipeline_mode = #tpu.pipeline_mode<synchronous>, transform_indices = @transform_1, window_bounds = array<i64: 256, 128>}, {pipeline_mode = #tpu.pipeline_mode<synchronous>, transform_indices = @transform_2, window_bounds = array<i64: 1, 128>}, {pipeline_mode = #tpu.pipeline_mode<synchronous>, transform_indices = @transform_3, window_bounds = array<i64: 128, 128>}, {pipeline_mode = #tpu.pipeline_mode<synchronous>, transform_indices = @transform_4, window_bounds = array<i64: 1, 128>}, {pipeline_mode = #tpu.pipeline_mode<synchronous>, transform_indices = @transform_5, window_bounds = array<i64: 128, 256>}, {pipeline_mode = #tpu.pipeline_mode<synchronous>, transform_indices = @transform_6, window_bounds = array<i64: 1, 256>}, {transform_indices = @transform_7, window_bounds = array<i64: 256, 256>}]} {
    %c0 = arith.constant 0 : index
    %c0_0 = arith.constant 0 : index
    %0 = vector.load %arg1[%c0, %c0_0] : memref<256x256xf32, #tpu.memory_space<vmem>>, vector<256x256xf32>
    %1 = arith.truncf %0 : vector<256x256xf32> to vector<256x256xbf16>
    %c0_1 = arith.constant 0 : index
    %c0_2 = arith.constant 0 : index
    %2 = vector.load %arg2[%c0_1, %c0_2] : memref<256x128xbf16, #tpu.memory_space<vmem>>, vector<256x128xbf16>
    %cst = arith.constant dense<0.000000e+00> : vector<256x128xf32>
    %3 = tpu.matmul %1, %2, %cst {dimension_numbers = #tpu.dot_dimension_numbers<[1], [0], [0], [1], [0, 0, 1, 1], [], []>} : vector<256x256xbf16>, vector<256x128xbf16>, vector<256x128xf32> -> vector<256x128xf32>
    %c0_3 = arith.constant 0 : index
    %c0_4 = arith.constant 0 : index
    %4 = vector.load %arg3[%c0_3, %c0_4] : memref<1x128xf32, #tpu.memory_space<vmem>>, vector<1x128xf32>
    %5 = vector.broadcast %4 : vector<1x128xf32> to vector<256x128xf32>
    %6 = arith.addf %3, %5 : vector<256x128xf32>
    %cst_5 = arith.constant 0.000000e+00 : f32
    %7 = vector.broadcast %cst_5 : f32 to vector<256x128xf32>
    %8 = arith.maximumf %6, %7 : vector<256x128xf32>
    %9 = arith.truncf %8 : vector<256x128xf32> to vector<256x128xbf16>
    %c0_6 = arith.constant 0 : index
    %c0_7 = arith.constant 0 : index
    %10 = vector.load %arg4[%c0_6, %c0_7] : memref<128x128xbf16, #tpu.memory_space<vmem>>, vector<128x128xbf16>
    %cst_8 = arith.constant dense<0.000000e+00> : vector<256x128xf32>
    %11 = tpu.matmul %9, %10, %cst_8 {dimension_numbers = #tpu.dot_dimension_numbers<[1], [0], [0], [1], [0, 0, 1, 1], [], []>} : vector<256x128xbf16>, vector<128x128xbf16>, vector<256x128xf32> -> vector<256x128xf32>
    %c0_9 = arith.constant 0 : index
    %c0_10 = arith.constant 0 : index
    %12 = vector.load %arg5[%c0_9, %c0_10] : memref<1x128xf32, #tpu.memory_space<vmem>>, vector<1x128xf32>
    %13 = vector.broadcast %12 : vector<1x128xf32> to vector<256x128xf32>
    %14 = arith.addf %11, %13 : vector<256x128xf32>
    %cst_11 = arith.constant 0.000000e+00 : f32
    %15 = vector.broadcast %cst_11 : f32 to vector<256x128xf32>
    %16 = arith.maximumf %14, %15 : vector<256x128xf32>
    %17 = arith.truncf %16 : vector<256x128xf32> to vector<256x128xbf16>
    %c0_12 = arith.constant 0 : index
    %c0_13 = arith.constant 0 : index
    %18 = vector.load %arg6[%c0_12, %c0_13] : memref<128x256xbf16, #tpu.memory_space<vmem>>, vector<128x256xbf16>
    %cst_14 = arith.constant dense<0.000000e+00> : vector<256x256xf32>
    %19 = tpu.matmul %17, %18, %cst_14 {dimension_numbers = #tpu.dot_dimension_numbers<[1], [0], [0], [1], [0, 0, 1, 1], [], []>} : vector<256x128xbf16>, vector<128x256xbf16>, vector<256x256xf32> -> vector<256x256xf32>
    %c0_15 = arith.constant 0 : index
    %c0_16 = arith.constant 0 : index
    %20 = vector.load %arg7[%c0_15, %c0_16] : memref<1x256xf32, #tpu.memory_space<vmem>>, vector<1x256xf32>
    %21 = vector.broadcast %20 : vector<1x256xf32> to vector<256x256xf32>
    %22 = arith.addf %19, %21 : vector<256x256xf32>
    %c0_17 = arith.constant 0 : index
    %c0_18 = arith.constant 0 : index
    %23 = vector.load %arg8[%c0_17, %c0_18] : memref<256x256xf32, #tpu.memory_space<vmem>>, vector<256x256xf32>
    tpu.vector_store %arg8[%c0_17, %c0_18], %22 {strides = array<i32>} : memref<256x256xf32, #tpu.memory_space<vmem>>, vector<256x256xf32>,
    return
  }
  func.func @transform_0(%arg0: i32) -> (i32, i32) {
    %c0_i32 = arith.constant 0 : i32
    %c0_i32_0 = arith.constant 0 : i32
    return %arg0, %c0_i32 : i32, i32
  }
  func.func @transform_1(%arg0: i32) -> (i32, i32) {
    %c0_i32 = arith.constant 0 : i32
    %c0_i32_0 = arith.constant 0 : i32
    %c0_i32_1 = arith.constant 0 : i32
    return %c0_i32, %c0_i32_0 : i32, i32
  }
  func.func @transform_2(%arg0: i32) -> (i32, i32) {
    %c0_i32 = arith.constant 0 : i32
    %c0_i32_0 = arith.constant 0 : i32
    %c0_i32_1 = arith.constant 0 : i32
    return %c0_i32, %c0_i32_0 : i32, i32
  }
  func.func @transform_3(%arg0: i32) -> (i32, i32) {
    %c0_i32 = arith.constant 0 : i32
    %c0_i32_0 = arith.constant 0 : i32
    %c0_i32_1 = arith.constant 0 : i32
    return %c0_i32, %c0_i32_0 : i32, i32
  }
  func.func @transform_4(%arg0: i32) -> (i32, i32) {
    %c0_i32 = arith.constant 0 : i32
    %c0_i32_0 = arith.constant 0 : i32
    %c0_i32_1 = arith.constant 0 : i32
    return %c0_i32, %c0_i32_0 : i32, i32
  }
  func.func @transform_5(%arg0: i32) -> (i32, i32) {
    %c0_i32 = arith.constant 0 : i32
    %c0_i32_0 = arith.constant 0 : i32
    %c0_i32_1 = arith.constant 0 : i32
    return %c0_i32, %c0_i32_0 : i32, i32
  }
  func.func @transform_6(%arg0: i32) -> (i32, i32) {
    %c0_i32 = arith.constant 0 : i32
    %c0_i32_0 = arith.constant 0 : i32
    %c0_i32_1 = arith.constant 0 : i32
    return %c0_i32, %c0_i32_0 : i32, i32
  }
  func.func @transform_7(%arg0: i32) -> (i32, i32) {
    %c0_i32 = arith.constant 0 : i32
    %c0_i32_0 = arith.constant 0 : i32
    return %arg0, %c0_i32 : i32, i32
  }
}

</mosaic_0001>

<bundles_post_ra>
// kernel: tpu_custom_call.1
= control target key start
LH: loop header
LB: loop body
LE: loop exit
PB: predicated region body
PF: predicated region fallthrough
CT: control target
= control target key end

     0   :  { %12 = vsyncpa [#allocation3], 0  ;;  %s1774_s0 = inlined_call_operand.hbm [shape: f32[256,256], index: 0, kind: input, shape index: {}]   ;;  %s1775_s1 = inlined_call_operand.hbm [shape: bf16[256,128], index: 1, kind: input, shape index: {}]   ;;  %s1776_s2 = inlined_call_operand.vmem [shape: f32[1,128], index: 2, kind: input, shape index: {}]   ;;  %s1777_s3 = inlined_call_operand.hbm [shape: bf16[128,128], index: 3, kind: input, shape index: {}]   ;;  %s1778_s4 = inlined_call_operand.hbm [shape: f32[1,128], index: 4, kind: input, shape index: {}]   ;;  %s1779_s5 = inlined_call_operand.hbm [shape: bf16[128,256], index: 5, kind: input, shape index: {}]   ;;  %s1780_s6 = inlined_call_operand.vmem [shape: f32[1,256], index: 6, kind: input, shape index: {}]   ;;  %s1781_s7 = inlined_call_operand.hbm [shape: f32[256,256], index: 7, kind: output, shape index: {}]  }
   0x1   :  { %13 = vsyncpa [#allocation6], 0 }
   0x2   :  { %14 = vsyncpa [#allocation9], 0  ;;  %s33_s26 = sshll.u32 %s1775_s1, 4  ;;  %s34_s26 = int_to_ptr.hbm [resolvable:$true] %s33_s26 }
   0x3   :  { %15 = vsyncpa [#allocation4], 0  ;;  %s1517_s27 = smov [#allocation5]   ;;  %s62_s8 = sshll.u32 %s1778_s4, 4  ;;  %s63_s8 = int_to_ptr.hbm [resolvable:$true] %s62_s8 }
   0x4   :  { %s35_s28 = sshll.u32 %s1517_s27, 4  ;;  %s1518_s9 = smov 64   ;;  %s36_s28 = int_to_ptr.vmem [resolvable:$true] %s35_s28 }
   0x5   :  { %s1519_s10 = smov 4   ;;  %s1520_s11 = smov [#allocation8]  }
   0x6   :  { %41 = dma.hbm_to_vmem [thread:$0]  %s34_s26, 2048, %s36_s28, [#allocation6], %s1518_s9, %s1518_s9, %s1519_s10  }
   0x7   :  { %s64_s12 = sshll.u32 %s1520_s11, 4  ;;  %s20_s15 = sshll.u32 %s1774_s0, 4  ;;  %s65_s12 = int_to_ptr.vmem [resolvable:$true] %s64_s12  ;;  %s21_s15 = int_to_ptr.hbm [resolvable:$true] %s20_s15 }
   0x8   :  { %67 = dma.hbm_to_vmem [thread:$0]  %s63_s8, 16, %s65_s12, [#allocation9]  }
   0x9   :  { %s1521_s1 = smov [#allocation2]   ;;  %s48_s4 = sshll.u32 %s1777_s3, 4  ;;  %s49_s4 = int_to_ptr.hbm [resolvable:$true] %s48_s4 }
   0xa   :  { %s22_s16 = sshll.u32 %s1521_s1, 4  ;;  %s1522_s19 = smov 256   ;;  %s23_s16 = int_to_ptr.vmem [resolvable:$true] %s22_s16 }
   0xb   :  { %s1523_s20 = smov 16   ;;  %s1524_s21 = smov [#allocation7]  }
   0xc   :  { %28 = dma.hbm_to_vmem [thread:$0]  %s21_s15, 8192, %s23_s16, [#allocation3], %s1522_s19, %s1522_s19, %s1523_s20  }
   0xd   :  { %s50_s22 = sshll.u32 %s1524_s21, 4  ;;  %s72_s24 = sshll.u32 %s1779_s5, 4  ;;  %s51_s22 = int_to_ptr.vmem [resolvable:$true] %s50_s22  ;;  %s73_s24 = int_to_ptr.hbm [resolvable:$true] %s72_s24 }
   0xe   :  { %56 = dma.hbm_to_vmem [thread:$0]  %s49_s4, 1024, %s51_s22, [#allocation6], %s1518_s9, %s1518_s9, %s1519_s10  }
   0xf   :  { %s1525_s25 = smov [#allocation10]   ;;  %s1526_s3 = smov 128  }
  0x10   :  { %s74_s26 = sshll.u32 %s1525_s25, 4  ;;  %s1527_s27 = smov 8   ;;  %s75_s26 = int_to_ptr.vmem [resolvable:$true] %s74_s26 }
  0x11   :  { %80 = dma.hbm_to_vmem [thread:$0]  %s73_s24, 2048, %s75_s26, [#allocation9], %s1526_s3, %s1526_s3, %s1527_s27  }
  0x12   :  { %1509 = dma.done.wait [#allocation3], 8192  }
  0x13   :  { %1510 = vsyncadd [#allocation3], 4294959104 }
  0x14   :  { %1511 = dma.done.wait [#allocation6], 3072  }
  0x15   :  { %1512 = vsyncadd [#allocation6], 4294964224 }
  0x16   :  { %1513 = dma.done.wait [#allocation9], 2064  }
  0x17   :  { %1514 = vsyncadd [#allocation9], 4294965232  ;;  %v1294_v0 = vld [vmem:[#allocation5 + $0x38] sm:$0xff]  ;;  %v1293_v1 = vld [vmem:[#allocation5 + $0x30] sm:$0xff]  ;;  %s1112_s10 = sshll.u32 %s1781_s7, 4  ;;  %s1113_s10 = int_to_ptr.hbm [resolvable:$true] %s1112_s10 }
  0x18   :  { %1327 = vmatpush.bf16.msra.mxu1 %v1294_v0  ;;  %331 = vmatpush.bf16.msra.mxu0 %v1294_v0  ;;  %v1292_v2 = vld [vmem:[#allocation5 + $0x28] sm:$0xff]  ;;  %v1291_v3 = vld [vmem:[#allocation5 + $0x20] sm:$0xff]  ;;  %v1290_v4 = vld [vmem:[#allocation5 + $0x18] sm:$0xff] }
  0x19   :  { %1328 = vmatpush.bf16.msra.mxu2 %v1294_v0  ;;  %1329 = vmatpush.bf16.msra.mxu3 %v1294_v0  ;;  %v1289_v5 = vld [vmem:[#allocation5 + $0x10] sm:$0xff]  ;;  %v1288_v6 = vld [vmem:[#allocation5 + $0x8] sm:$0xff]  ;;  %v1287_v7 = vld [vmem:[#allocation5] sm:$0xff] }
  0x1a   :  { %v119_v8 = vld [vmem:[#allocation2 + $0x80] sm:$0xff]  ;;  %v121_v9 = vld [vmem:[#allocation2 + $0x90] sm:$0xff]  ;;  %v1302_v10 = vld [vmem:[#allocation5 + $0x78] sm:$0xff] }
  0x1b   :  { %v175_v11 = vpack.c.bf16 %v121_v9, %v119_v8  ;;  %v1301_v12 = vld [vmem:[#allocation5 + $0x70] sm:$0xff]  ;;  %v1300_v13 = vld [vmem:[#allocation5 + $0x68] sm:$0xff]  ;;  %v1299_v14 = vld [vmem:[#allocation5 + $0x60] sm:$0xff] }
  0x1c   :  { %1330 = vmatpush.bf16.msra.mxu1 %v1293_v1  ;;  %332 = vmatpush.bf16.msra.mxu0 %v1293_v1  ;;  %v123_v15 = vld [vmem:[#allocation2 + $0xa0] sm:$0xff]  ;;  %v125_v16 = vld [vmem:[#allocation2 + $0xb0] sm:$0xff]  ;;  %v1298_v17 = vld [vmem:[#allocation5 + $0x58] sm:$0xff] }
  0x1d   :  { %1331 = vmatpush.bf16.msra.mxu2 %v1293_v1  ;;  %1332 = vmatpush.bf16.msra.mxu3 %v1293_v1  ;;  %v177_v18 = vpack.c.bf16 %v125_v16, %v123_v15  ;;  %v1297_v19 = vld [vmem:[#allocation5 + $0x50] sm:$0xff]  ;;  %v103_v20 = vld [vmem:[#allocation2] sm:$0xff]  ;;  %v1296_v23 = vld [vmem:[#allocation5 + $0x48] sm:$0xff] }
  0x1e   :  { %v105_v21 = vld [vmem:[#allocation2 + $0x10] sm:$0xff]  ;;  %v1295_v24 = vld [vmem:[#allocation5 + $0x40] sm:$0xff]  ;;  %v104_v37 = vld [vmem:[#allocation2 + $0x8] sm:$0xff] }
  0x1f   :  { %v167_v22 = vpack.c.bf16 %v105_v21, %v103_v20  ;;  %v127_v25 = vld [vmem:[#allocation2 + $0xc0] sm:$0xff]  ;;  %v129_v26 = vld [vmem:[#allocation2 + $0xd0] sm:$0xff]  ;;  %v106_v38 = vld [vmem:[#allocation2 + $0x18] sm:$0xff] }
  0x20   :  { %1333 = vmatpush.bf16.msra.mxu1 %v1292_v2  ;;  %333 = vmatpush.bf16.msra.mxu0 %v1292_v2  ;;  %v179_v27 = vpack.c.bf16 %v129_v26, %v127_v25  ;;  %v107_v28 = vld [vmem:[#allocation2 + $0x20] sm:$0xff]  ;;  %v109_v29 = vld [vmem:[#allocation2 + $0x30] sm:$0xff]  ;;  %v168_v39 = vpack.c.bf16 %v106_v38, %v104_v37  ;;  %v108_v43 = vld [vmem:[#allocation2 + $0x28] sm:$0xff] }
  0x21   :  { %1334 = vmatpush.bf16.msra.mxu2 %v1292_v2  ;;  %1335 = vmatpush.bf16.msra.mxu3 %v1292_v2  ;;  %v169_v30 = vpack.c.bf16 %v109_v29, %v107_v28  ;;  %v131_v31 = vld [vmem:[#allocation2 + $0xe0] sm:$0xff]  ;;  %v133_v32 = vld [vmem:[#allocation2 + $0xf0] sm:$0xff]  ;;  %v110_v44 = vld [vmem:[#allocation2 + $0x38] sm:$0xff] }
  0x22   :  { %v181_v33 = vpack.c.bf16 %v133_v32, %v131_v31  ;;  %v111_v34 = vld [vmem:[#allocation2 + $0x40] sm:$0xff]  ;;  %v113_v35 = vld [vmem:[#allocation2 + $0x50] sm:$0xff]  ;;  %v170_v45 = vpack.c.bf16 %v110_v44, %v108_v43  ;;  %v112_v46 = vld [vmem:[#allocation2 + $0x48] sm:$0xff] }
  0x23   :  { %v171_v36 = vpack.c.bf16 %v113_v35, %v111_v34  ;;  %v115_v40 = vld [vmem:[#allocation2 + $0x60] sm:$0xff]  ;;  %v117_v41 = vld [vmem:[#allocation2 + $0x70] sm:$0xff]  ;;  %v114_v47 = vld [vmem:[#allocation2 + $0x58] sm:$0xff] }
  0x24   :  { %1336 = vmatpush.bf16.msra.mxu1 %v1291_v3  ;;  %334 = vmatpush.bf16.msra.mxu0 %v1291_v3  ;;  %v173_v42 = vpack.c.bf16 %v117_v41, %v115_v40  ;;  %v172_v48 = vpack.c.bf16 %v114_v47, %v112_v46  ;;  %v135_v49 = vld [vmem:[#allocation2 + $0x100] sm:$0xff]  ;;  %v137_v50 = vld [vmem:[#allocation2 + $0x110] sm:$0xff]  ;;  %v1310_v52 = vld [vmem:[#allocation7 + $0x38] sm:$0xff] }
  0x25   :  { %1337 = vmatpush.bf16.msra.mxu2 %v1291_v3  ;;  %1338 = vmatpush.bf16.msra.mxu3 %v1291_v3  ;;  %v183_v51 = vpack.c.bf16 %v137_v50, %v135_v49  ;;  %v116_v53 = vld [vmem:[#allocation2 + $0x68] sm:$0xff]  ;;  %v118_v54 = vld [vmem:[#allocation2 + $0x78] sm:$0xff]  ;;  %v139_v56 = vld [vmem:[#allocation2 + $0x120] sm:$0xff] }
  0x26   :  { %v174_v55 = vpack.c.bf16 %v118_v54, %v116_v53  ;;  %v141_v57 = vld [vmem:[#allocation2 + $0x130] sm:$0xff]  ;;  %v1308_v60 = vld [vmem:[#allocation7 + $0x28] sm:$0xff]  ;;  %v122_v62 = vld [vmem:[#allocation2 + $0x98] sm:$0xff] }
  0x27   :  { %v1309_v58 = vld [vmem:[#allocation7 + $0x30] sm:$0xff]  ;;  %v185_v59 = vpack.c.bf16 %v141_v57, %v139_v56  ;;  %v120_v61 = vld [vmem:[#allocation2 + $0x88] sm:$0xff]  ;;  %v143_v1 = vld [vmem:[#allocation2 + $0x140] sm:$0xff] }
  0x28   :  { %1339 = vmatpush.bf16.msra.mxu1 %v1290_v4  ;;  %335 = vmatpush.bf16.msra.mxu0 %v1290_v4  ;;  %v176_v63 = vpack.c.bf16 %v122_v62, %v120_v61  ;;  %v145_v2 = vld [vmem:[#allocation2 + $0x150] sm:$0xff]  ;;  %v1307_v3 = vld [vmem:[#allocation7 + $0x20] sm:$0xff]  ;;  %v126_v8 = vld [vmem:[#allocation2 + $0xb8] sm:$0xff] }
  0x29   :  { %1340 = vmatpush.bf16.msra.mxu2 %v1290_v4  ;;  %1341 = vmatpush.bf16.msra.mxu3 %v1290_v4  ;;  %v187_v4 = vpack.c.bf16 %v145_v2, %v143_v1  ;;  %v1304_v16 = vld [vmem:[#allocation7 + $0x8] sm:$0xff]  ;;  %v1303_v21 = vld [vmem:[#allocation7] sm:$0xff]  ;;  %v138_v31 = vld [vmem:[#allocation2 + $0x118] sm:$0xff] }
  0x2a   :  { %v1606_v34 = vld [vmem:[%s1776_s2] ss:$0 sm:$0xff]  ;;  %v140_v44 = vld [vmem:[#allocation2 + $0x128] sm:$0xff]  ;;  %v153_v50 = vld [vmem:[#allocation2 + $0x190] sm:$0xff] }
  0x2b   :  { %v151_v49 = vld [vmem:[#allocation2 + $0x180] sm:$0xff]  ;;  %v146_v61 = vld [vmem:[#allocation2 + $0x158] sm:$0xff] }
  0x2c   :  { %1342 = vmatpush.bf16.msra.mxu1 %v1289_v5  ;;  %336 = vmatpush.bf16.msra.mxu0 %v1289_v5 }
  0x2d   :  { %1343 = vmatpush.bf16.msra.mxu2 %v1289_v5  ;;  %1344 = vmatpush.bf16.msra.mxu3 %v1289_v5 }
  0x30   :  { %1345 = vmatpush.bf16.msra.mxu1 %v1288_v6  ;;  %337 = vmatpush.bf16.msra.mxu0 %v1288_v6 }
  0x31   :  { %1346 = vmatpush.bf16.msra.mxu2 %v1288_v6  ;;  %1347 = vmatpush.bf16.msra.mxu3 %v1288_v6  ;;  %v1306_v6 = vld [vmem:[#allocation7 + $0x18] sm:$0xff] }
  0x34   :  { %1348 = vmatpush.bf16.msra.mxu1 %v1287_v7  ;;  %338 = vmatpush.bf16.msra.mxu0 %v1287_v7 }
  0x35   :  { %1349 = vmatpush.bf16.msra.mxu2 %v1287_v7  ;;  %1350 = vmatpush.bf16.msra.mxu3 %v1287_v7  ;;  %v124_v7 = vld [vmem:[#allocation2 + $0xa8] sm:$0xff] }
  0x36   :  { %v178_v9 = vpack.c.bf16 %v126_v8, %v124_v7 }
  0x37   :  { %359 = vmatmul.bf16.vlgmr.msra.gmra.mxu1 %v175_v11  ;;  %339 = vmatmul.bf16.vlgmr.msra.gmra.mxu0 %v167_v22  ;;  %v147_v11 = vld [vmem:[#allocation2 + $0x160] sm:$0xff] }
  0x38   :  { %420 = vmatpush.bf16.msrb.mxu1 %v1302_v10  ;;  %379 = vmatmul.bf16.vlgmr.msra.gmra.mxu2 %v183_v51  ;;  %v191_v51 = vpack.c.bf16 %v153_v50, %v151_v49  ;;  %v1325_v50 = vld [vmem:[#allocation10 + $0x74] sm:$0xf] }
  0x39   :  { %625 = vmatpush.bf16.msrb.mxu2 %v1310_v52 }
  0x3a   :  { %399 = vmatmul.bf16.vlgmr.msra.gmra.mxu3 %v191_v51  ;;  %v1283_v51 = vld [vmem:[#allocation10 + $0x78] sm:$0xf0] }
  0x3c   :  { %421 = vmatpush.bf16.msrb.mxu1 %v1301_v12  ;;  %v149_v12 = vld [vmem:[#allocation2 + $0x170] sm:$0xff] }
  0x3d   :  { %626 = vmatpush.bf16.msrb.mxu2 %v1309_v58 }
  0x40   :  { %422 = vmatpush.bf16.msrb.mxu1 %v1300_v13  ;;  %v1305_v13 = vld [vmem:[#allocation7 + $0x10] sm:$0xff] }
  0x41   :  { %627 = vmatpush.bf16.msrb.mxu2 %v1308_v60  ;;  %v144_v60 = vld [vmem:[#allocation2 + $0x148] sm:$0xff] }
  0x44   :  { %423 = vmatpush.bf16.msrb.mxu1 %v1299_v14  ;;  %v189_v14 = vpack.c.bf16 %v149_v12, %v147_v11 }
  0x45   :  { %628 = vmatpush.bf16.msrb.mxu2 %v1307_v3  ;;  %v155_v3 = vld [vmem:[#allocation2 + $0x1a0] sm:$0xff] }
  0x47   :  { %364 = vmatmul.bf16.gmra.mxu1 %v177_v18  ;;  %344 = vmatmul.bf16.gmra.mxu0 %v169_v30  ;;  %v130_v18 = vld [vmem:[#allocation2 + $0xd8] sm:$0xff]  ;;  %v136_v30 = vld [vmem:[#allocation2 + $0x108] sm:$0xff] }
  0x48   :  { %424 = vmatpush.bf16.msrb.mxu1 %v1298_v17  ;;  %384 = vmatmul.bf16.gmra.mxu2 %v185_v59  ;;  %v128_v17 = vld [vmem:[#allocation2 + $0xc8] sm:$0xff]  ;;  %v184_v32 = vpack.c.bf16 %v138_v31, %v136_v30 }
  0x49   :  { %629 = vmatpush.bf16.msrb.mxu2 %v1306_v6 }
  0x4c   :  { %425 = vmatpush.bf16.msrb.mxu1 %v1297_v19  ;;  %v180_v19 = vpack.c.bf16 %v130_v18, %v128_v17  ;;  %v148_v17 = vld [vmem:[#allocation2 + $0x168] sm:$0xff]  ;;  %v150_v18 = vld [vmem:[#allocation2 + $0x178] sm:$0xff] }
  0x4d   :  { %630 = vmatpush.bf16.msrb.mxu2 %v1305_v13 }
  0x50   :  { %426 = vmatpush.bf16.msrb.mxu1 %v1296_v23  ;;  %v132_v23 = vld [vmem:[#allocation2 + $0xe8] sm:$0xff] }
  0x51   :  { %631 = vmatpush.bf16.msrb.mxu2 %v1304_v16 }
  0x54   :  { %427 = vmatpush.bf16.msrb.mxu1 %v1295_v24  ;;  %v134_v24 = vld [vmem:[#allocation2 + $0xf8] sm:$0xff] }
  0x55   :  { %632 = vmatpush.bf16.msrb.mxu2 %v1303_v21  ;;  %v182_v26 = vpack.c.bf16 %v134_v24, %v132_v23  ;;  %v190_v21 = vpack.c.bf16 %v150_v18, %v148_v17  ;;  %v159_v24 = vld [vmem:[#allocation2 + $0x1c0] sm:$0xff] }
  0x57   :  { %369 = vmatmul.bf16.gmra.mxu1 %v179_v27  ;;  %349 = vmatmul.bf16.gmra.mxu0 %v171_v36 }
  0x58   :  { %389 = vmatmul.bf16.gmra.mxu2 %v187_v4  ;;  %v157_v4 = vld [vmem:[#allocation2 + $0x1b0] sm:$0xff] }
  0x59   :  { %v193_v6 = vpack.c.bf16 %v157_v4, %v155_v3  ;;  %v1323_v4 = vld [vmem:[#allocation10 + $0x64] sm:$0xf] }
  0x5b   :  { %404 = vmatmul.bf16.gmra.mxu3 %v193_v6  ;;  %v1275_v6 = vld [vmem:[#allocation10 + $0x68] sm:$0xf0] }
  0x67   :  { %374 = vmatmul.bf16.gmra.mxu1 %v181_v33  ;;  %354 = vmatmul.bf16.gmra.mxu0 %v173_v42 }
  0x68   :  { %394 = vmatmul.bf16.gmra.mxu2 %v189_v14 }
  0x77   :  { %428 = vmatmul.bf16.vlgmr.msrb.gmra.mxu1 %v168_v39 }
  0x87   :  { %433 = vmatmul.bf16.gmra.mxu1 %v170_v45  ;;  %v142_v45 = vld [vmem:[#allocation2 + $0x138] sm:$0xff] }
  0x88   :  { %v186_v47 = vpack.c.bf16 %v142_v45, %v140_v44  ;;  %v165_v44 = vld [vmem:[#allocation2 + $0x1f0] sm:$0xff] }
  0x97   :  { %438 = vmatmul.bf16.gmra.mxu1 %v172_v48 }
  0xa7   :  { %443 = vmatmul.bf16.gmra.mxu1 %v174_v55 }
  0xb4   :  { %v1587_v0 = vpop.f32.mrf.mxu1  ;;  %v340_v25 = vpop.f32.mrf.mxu0 }
  0xb5   :  { %v341_v36 = vadd.f32 %v1606_v34, %v340_v25  ;;  %v161_v25 = vld [vmem:[#allocation2 + $0x1d0] sm:$0xff] }
  0xb7   :  { %448 = vmatmul.bf16.gmra.mxu1 %v176_v63  ;;  %v188_v63 = vpack.c.bf16 %v146_v61, %v144_v60  ;;  %v1273_v60 = vld [vmem:[#allocation10 + $0x60] sm:$0xf]  ;;  %v1324_v61 = vld [vmem:[#allocation10 + $0x64] sm:$0xf0] }
  0xbc   :  { %v1589_v5 = vpop.f32.mrf.mxu1  ;;  %v342_v29 = vpop.f32.mrf.mxu0 }
  0xbd   :  { %v343_v37 = vadd.f32 %v1606_v34, %v342_v29 }
  0xc4   :  { %v1591_v10 = vpop.f32.mrf.mxu1  ;;  %v345_v35 = vpop.f32.mrf.mxu0 }
  0xc5   :  { %v346_v52 = vadd.f32 %v1606_v34, %v345_v35 }
  0xc7   :  { %453 = vmatmul.bf16.gmra.mxu1 %v178_v9 }
  0xcc   :  { %v1593_v15 = vpop.f32.mrf.mxu1  ;;  %v347_v43 = vpop.f32.mrf.mxu0 }
  0xcd   :  { %v348_v54 = vadd.f32 %v1606_v34, %v347_v43  ;;  %v163_v43 = vld [vmem:[#allocation2 + $0x1e0] sm:$0xff]  ;;  %v368_v17 = vadd.f32 %v1606_v34, %v1593_v15 }
  0xce   :  { %v197_v45 = vpack.c.bf16 %v165_v44, %v163_v43  ;;  %v1251_v43 = vld [vmem:[#allocation10 + $0x38] sm:$0xf0] }
  0xd4   :  { %v1595_v20 = vpop.f32.mrf.mxu1  ;;  %v350_v53 = vpop.f32.mrf.mxu0 }
  0xd5   :  { %v351_v7 = vadd.f32 %v1606_v34, %v350_v53  ;;  %v1286_v53 = vor.u32 %v1325_v50, %v1283_v51  ;;  %v371_v44 = vadd.f32 %v1606_v34, %v1595_v20 }
  0xd7   :  { %458 = vmatmul.bf16.gmra.mxu1 %v180_v19  ;;  %953 = vmatpush.bf16.msrb.mxu0 %v1286_v53 }
  0xdc   :  { %v1597_v22 = vpop.f32.mrf.mxu1  ;;  %v352_v1 = vpop.f32.mrf.mxu0 }
  0xdd   :  { %v353_v8 = vadd.f32 %v1606_v34, %v352_v1  ;;  %v1274_v1 = vor.u32 %v1324_v61, %v1273_v60  ;;  %v1315_v60 = vld [vmem:[#allocation10 + $0x24] sm:$0xf]  ;;  %v1243_v61 = vld [vmem:[#allocation10 + $0x28] sm:$0xf0] }
  0xe4   :  { %v1599_v27 = vpop.f32.mrf.mxu1  ;;  %v355_v13 = vpop.f32.mrf.mxu0 }
  0xe5   :  { %v356_v29 = vadd.f32 %v1606_v34, %v355_v13  ;;  %v1267_v13 = vld [vmem:[#allocation10 + $0x58] sm:$0xf0] }
  0xe7   :  { %463 = vmatmul.bf16.gmra.mxu1 %v182_v26  ;;  %v195_v26 = vpack.c.bf16 %v161_v25, %v159_v24 }
  0xe9   :  { %409 = vmatmul.bf16.gmra.mxu3 %v195_v26  ;;  %v1257_v26 = vld [vmem:[#allocation10 + $0x40] sm:$0xf] }
  0xec   :  { %v1601_v28 = vpop.f32.mrf.mxu1  ;;  %v357_v30 = vpop.f32.mrf.mxu0 }
  0xed   :  { %v358_v31 = vadd.f32 %v1606_v34, %v357_v30  ;;  %v160_v30 = vld [vmem:[#allocation2 + $0x1c8] sm:$0xff] }
  0xf4   :  { %v429_v33 = vpop.f32.mrf.mxu1 }
  0xf5   :  { %v430_v38 = vadd.f32 %v429_v33, %v341_v36 }
  0xf7   :  { %468 = vmatmul.bf16.gmra.mxu1 %v184_v32  ;;  %v509_v41 = vmax.f32 %v430_v38, 0.0  ;;  %v152_v38 = vld [vmem:[#allocation2 + $0x188] sm:$0xff] }
  0xf9   :  { %414 = vmatmul.bf16.gmra.mxu3 %v197_v45 }
  0xfc   :  { %v431_v39 = vpop.f32.mrf.mxu1 }
  0xfd   :  { %v432_v40 = vadd.f32 %v431_v39, %v343_v37  ;;  %v154_v39 = vld [vmem:[#allocation2 + $0x198] sm:$0xff] }
  0xff   :  { %v510_v42 = vmax.f32 %v432_v40, 0.0 }
 0x101   :  { %v541_v46 = vpack.c.bf16 %v510_v42, %v509_v41  ;;  %v192_v41 = vpack.c.bf16 %v154_v39, %v152_v38  ;;  %v1249_v39 = vld [vmem:[#allocation10 + $0x30] sm:$0xf] }
 0x103   :  { %633 = vmatmul.bf16.vlgmr.msrb.gmra.mxu2 %v541_v46  ;;  %v1281_v46 = vld [vmem:[#allocation10 + $0x70] sm:$0xf] }
 0x104   :  { %v434_v48 = vpop.f32.mrf.mxu1 }
 0x105   :  { %v435_v55 = vadd.f32 %v434_v48, %v346_v52  ;;  %v1616_v48 = vpop.f32.mrf.mxu2  ;;  %v361_v52 = vadd.f32 %v1606_v34, %v1587_v0 }
 0x107   :  { %473 = vmatmul.bf16.gmra.mxu1 %v186_v47  ;;  %v511_v58 = vmax.f32 %v435_v55, 0.0  ;;  %v1326_v47 = vld [vmem:[#allocation10 + $0x74] sm:$0xf0] }
 0x108   :  { %v1282_v49 = vor.u32 %v1326_v47, %v1281_v46  ;;  %v373_v46 = vadd.f32 %v1606_v34, %v1597_v22  ;;  %v1246_v22 = vor.u32 %v1315_v60, %v1243_v61 }
 0x10a   :  { %864 = vmatpush.bf16.msrb.mxu3 %v1282_v49 }
 0x10c   :  { %v436_v56 = vpop.f32.mrf.mxu1 }
 0x10d   :  { %v437_v57 = vadd.f32 %v436_v56, %v348_v54  ;;  %v363_v54 = vadd.f32 %v1606_v34, %v1589_v5  ;;  %v1622_v3 = vpop.f32.mrf.mxu2 }
 0x10e   :  { %865 = vmatpush.bf16.msrb.mxu3 %v1274_v1  ;;  %v1314_v1 = vld [vmem:[#allocation10 + $0x14] sm:$0xf0] }
 0x10f   :  { %v512_v59 = vmax.f32 %v437_v57, 0.0 }
 0x111   :  { %v542_v62 = vpack.c.bf16 %v512_v59, %v511_v58 }
 0x113   :  { %638 = vmatmul.bf16.gmra.mxu2 %v542_v62  ;;  %v156_v62 = vld [vmem:[#allocation2 + $0x1a8] sm:$0xff] }
 0x114   :  { %v439_v2 = vpop.f32.mrf.mxu1 }
 0x115   :  { %v440_v9 = vadd.f32 %v439_v2, %v351_v7  ;;  %v1278_v7 = vor.u32 %v1323_v4, %v1275_v6  ;;  %v1313_v4 = vld [vmem:[#allocation10 + $0x14] sm:$0xf]  ;;  %v1235_v6 = vld [vmem:[#allocation10 + $0x18] sm:$0xf0] }
 0x117   :  { %478 = vmatmul.bf16.gmra.mxu1 %v188_v63  ;;  %v513_v14 = vmax.f32 %v440_v9, 0.0  ;;  %v158_v63 = vld [vmem:[#allocation2 + $0x1b8] sm:$0xff]  ;;  %954 = vmatpush.bf16.msrb.mxu0 %v1278_v7  ;;  %v1238_v7 = vor.u32 %v1313_v4, %v1235_v6 }
 0x118   :  { %v194_v0 = vpack.c.bf16 %v158_v63, %v156_v62  ;;  %v1322_v9 = vld [vmem:[#allocation10 + $0x54] sm:$0xf0]  ;;  %v1233_v63 = vld [vmem:[#allocation10 + $0x10] sm:$0xf] }
 0x11c   :  { %v441_v11 = vpop.f32.mrf.mxu1 }
 0x11d   :  { %v442_v12 = vadd.f32 %v441_v11, %v353_v8  ;;  %v1265_v8 = vld [vmem:[#allocation10 + $0x50] sm:$0xf] }
 0x11e   :  { %v1266_v11 = vor.u32 %v1322_v9, %v1265_v8  ;;  %v378_v8 = vadd.f32 %v1606_v34, %v1601_v28  ;;  %v381_v28 = vadd.f32 %v1606_v34, %v1616_v48 }
 0x11f   :  { %v514_v16 = vmax.f32 %v442_v12, 0.0  ;;  %v1321_v12 = vld [vmem:[#allocation10 + $0x54] sm:$0xf] }
 0x120   :  { %866 = vmatpush.bf16.msrb.mxu3 %v1266_v11 }
 0x121   :  { %v543_v19 = vpack.c.bf16 %v514_v16, %v513_v14  ;;  %v366_v14 = vadd.f32 %v1606_v34, %v1591_v10  ;;  %v1270_v16 = vor.u32 %v1321_v12, %v1267_v13 }
 0x123   :  { %643 = vmatmul.bf16.gmra.mxu2 %v543_v19  ;;  %955 = vmatpush.bf16.msrb.mxu0 %v1270_v16  ;;  %v1225_v16 = vld [vmem:[#allocation10] sm:$0xf] }
 0x124   :  { %v444_v23 = vpop.f32.mrf.mxu1 }
 0x125   :  { %v445_v32 = vadd.f32 %v444_v23, %v356_v29  ;;  %v1320_v29 = vld [vmem:[#allocation10 + $0x44] sm:$0xf0] }
 0x127   :  { %483 = vmatmul.bf16.gmra.mxu1 %v190_v21  ;;  %v515_v36 = vmax.f32 %v445_v32, 0.0  ;;  %v1628_v21 = vpop.f32.mrf.mxu2  ;;  %v1258_v32 = vor.u32 %v1320_v29, %v1257_v26  ;;  %v383_v29 = vadd.f32 %v1606_v34, %v1622_v3 }
 0x129   :  { %867 = vmatpush.bf16.msrb.mxu3 %v1258_v32 }
 0x12c   :  { %v446_v33 = vpop.f32.mrf.mxu1 }
 0x12d   :  { %v447_v35 = vadd.f32 %v446_v33, %v358_v31  ;;  %v162_v31 = vld [vmem:[#allocation2 + $0x1d8] sm:$0xff] }
 0x12e   :  { %v196_v10 = vpack.c.bf16 %v162_v31, %v160_v30 }
 0x12f   :  { %v516_v37 = vmax.f32 %v447_v35, 0.0  ;;  %v1319_v35 = vld [vmem:[#allocation10 + $0x44] sm:$0xf]  ;;  %v1630_v38 = vpop.f32.mrf.mxu2 }
 0x130   :  { %v388_v48 = vadd.f32 %v1606_v34, %v1630_v38 }
 0x131   :  { %v544_v40 = vpack.c.bf16 %v516_v37, %v515_v36  ;;  %v1259_v36 = vld [vmem:[#allocation10 + $0x48] sm:$0xf0] }
 0x132   :  { %v1262_v37 = vor.u32 %v1319_v35, %v1259_v36 }
 0x133   :  { %648 = vmatmul.bf16.gmra.mxu2 %v544_v40  ;;  %v1318_v40 = vld [vmem:[#allocation10 + $0x34] sm:$0xf0] }
 0x134   :  { %v449_v42 = vpop.f32.mrf.mxu1  ;;  %956 = vmatpush.bf16.msrb.mxu0 %v1262_v37 }
 0x135   :  { %v450_v55 = vadd.f32 %v449_v42, %v361_v52  ;;  %v1317_v42 = vld [vmem:[#allocation10 + $0x34] sm:$0xf] }
 0x136   :  { %v1254_v45 = vor.u32 %v1317_v42, %v1251_v43 }
 0x137   :  { %488 = vmatmul.bf16.gmra.mxu1 %v192_v41  ;;  %v517_v58 = vmax.f32 %v450_v55, 0.0  ;;  %v1250_v41 = vor.u32 %v1318_v40, %v1249_v39  ;;  %v1636_v53 = vpop.f32.mrf.mxu2  ;;  %v166_v55 = vld [vmem:[#allocation2 + $0x1f8] sm:$0xff]  ;;  %v386_v39 = vadd.f32 %v1606_v34, %v1628_v21  ;;  %v1648_v40 = vld [vmem:[#allocation8] ss:$0 sm:$0xff] }
 0x138   :  { %957 = vmatpush.bf16.msrb.mxu0 %v1254_v45  ;;  %v391_v38 = vadd.f32 %v1606_v34, %v1636_v53 }
 0x139   :  { %868 = vmatpush.bf16.msrb.mxu3 %v1250_v41 }
 0x13c   :  { %v451_v56 = vpop.f32.mrf.mxu1  ;;  %958 = vmatpush.bf16.msrb.mxu0 %v1246_v22 }
 0x13d   :  { %v452_v57 = vadd.f32 %v451_v56, %v363_v54  ;;  %v164_v54 = vld [vmem:[#allocation2 + $0x1e8] sm:$0xff] }
 0x13e   :  { %v198_v20 = vpack.c.bf16 %v166_v55, %v164_v54 }
 0x13f   :  { %v518_v59 = vmax.f32 %v452_v57, 0.0  ;;  %v1241_v57 = vld [vmem:[#allocation10 + $0x20] sm:$0xf] }
 0x140   :  { %959 = vmatpush.bf16.msrb.mxu0 %v1238_v7 }
 0x141   :  { %v545_v2 = vpack.c.bf16 %v518_v59, %v517_v58  ;;  %v1316_v58 = vld [vmem:[#allocation10 + $0x24] sm:$0xf0] }
 0x142   :  { %v1242_v59 = vor.u32 %v1316_v58, %v1241_v57 }
 0x143   :  { %653 = vmatmul.bf16.gmra.mxu2 %v545_v2  ;;  %v1234_v2 = vor.u32 %v1314_v1, %v1233_v63 }
 0x144   :  { %v454_v5 = vpop.f32.mrf.mxu1  ;;  %869 = vmatpush.bf16.msrb.mxu3 %v1242_v59 }
 0x145   :  { %v455_v18 = vadd.f32 %v454_v5, %v366_v14  ;;  %v392_v5 = vpop.f32.mrf.mxu2 }
 0x146   :  { %v393_v55 = vadd.f32 %v1606_v34, %v392_v5 }
 0x147   :  { %493 = vmatmul.bf16.gmra.mxu1 %v194_v0  ;;  %v519_v24 = vmax.f32 %v455_v18, 0.0  ;;  %v376_v0 = vadd.f32 %v1606_v34, %v1599_v27 }
 0x148   :  { %870 = vmatpush.bf16.msrb.mxu3 %v1234_v2  ;;  %v400_v2 = vpop.f32.mrf.mxu3 }
 0x14c   :  { %v456_v19 = vpop.f32.mrf.mxu1 }
 0x14d   :  { %v457_v23 = vadd.f32 %v456_v19, %v368_v17  ;;  %v1312_v17 = vld [vmem:[#allocation10 + $0x4] sm:$0xf0]  ;;  %v1311_v19 = vld [vmem:[#allocation10 + $0x4] sm:$0xf] }
 0x14e   :  { %v1226_v18 = vor.u32 %v1312_v17, %v1225_v16 }
 0x14f   :  { %v520_v25 = vmax.f32 %v457_v23, 0.0  ;;  %v1227_v23 = vld [vmem:[#allocation10 + $0x8] sm:$0xf0] }
 0x150   :  { %871 = vmatpush.bf16.msrb.mxu3 %v1226_v18 }
 0x151   :  { %v546_v33 = vpack.c.bf16 %v520_v25, %v519_v24  ;;  %v1230_v24 = vor.u32 %v1311_v19, %v1227_v23  ;;  %v395_v25 = vpop.f32.mrf.mxu2 }
 0x152   :  { %v396_v6 = vadd.f32 %v1606_v34, %v395_v25 }
 0x153   :  { %658 = vmatmul.bf16.gmra.mxu2 %v546_v33  ;;  %960 = vmatpush.bf16.msrb.mxu0 %v1230_v24 }
 0x154   :  { %v459_v15 = vpop.f32.mrf.mxu1 }
 0x155   :  { %v460_v47 = vadd.f32 %v459_v15, %v371_v44 }
 0x157   :  { %498 = vmatmul.bf16.gmra.mxu1 %v196_v10  ;;  %v521_v51 = vmax.f32 %v460_v47, 0.0 }
 0x159   :  { %v397_v33 = vpop.f32.mrf.mxu2 }
 0x15a   :  { %v398_v5 = vadd.f32 %v1606_v34, %v397_v33 }
 0x15c   :  { %v461_v49 = vpop.f32.mrf.mxu1 }
 0x15d   :  { %v462_v50 = vadd.f32 %v461_v49, %v373_v46 }
 0x15f   :  { %v522_v52 = vmax.f32 %v462_v50, 0.0 }
 0x161   :  { %v547_v56 = vpack.c.bf16 %v522_v52, %v521_v51 }
 0x163   :  { %663 = vmatmul.bf16.gmra.mxu2 %v547_v56 }
 0x164   :  { %v464_v62 = vpop.f32.mrf.mxu1 }
 0x165   :  { %v465_v9 = vadd.f32 %v464_v62, %v376_v0 }
 0x167   :  { %503 = vmatmul.bf16.gmra.mxu1 %v198_v20  ;;  %v523_v13 = vmax.f32 %v465_v9, 0.0  ;;  %v402_v9 = vpop.f32.mrf.mxu3 }
 0x16c   :  { %v466_v11 = vpop.f32.mrf.mxu1 }
 0x16d   :  { %v467_v12 = vadd.f32 %v466_v11, %v378_v8 }
 0x16f   :  { %v524_v14 = vmax.f32 %v467_v12, 0.0 }
 0x171   :  { %v548_v27 = vpack.c.bf16 %v524_v14, %v523_v13 }
 0x173   :  { %668 = vmatmul.bf16.gmra.mxu2 %v548_v27 }
 0x174   :  { %v469_v26 = vpop.f32.mrf.mxu1 }
 0x175   :  { %v470_v30 = vadd.f32 %v469_v26, %v381_v28  ;;  %v405_v26 = vpop.f32.mrf.mxu3  ;;  %v401_v28 = vadd.f32 %v1606_v34, %v400_v2 }
 0x177   :  { %v525_v10 = vmax.f32 %v470_v30, 0.0 }
 0x17c   :  { %v471_v31 = vpop.f32.mrf.mxu1 }
 0x17d   :  { %v472_v32 = vadd.f32 %v471_v31, %v383_v29  ;;  %v403_v29 = vadd.f32 %v1606_v34, %v402_v9 }
 0x17f   :  { %v526_v35 = vmax.f32 %v472_v32, 0.0 }
 0x181   :  { %v549_v36 = vpack.c.bf16 %v526_v35, %v525_v10 }
 0x183   :  { %673 = vmatmul.bf16.gmra.mxu2 %v549_v36 }
 0x184   :  { %v474_v15 = vpop.f32.mrf.mxu1 }
 0x185   :  { %v475_v41 = vadd.f32 %v474_v15, %v386_v39 }
 0x186   :  { %v634_v37 = vpop.f32.mrf.mxu2 }
 0x187   :  { %v635_v42 = vadd.f32 %v1648_v40, %v634_v37  ;;  %v527_v45 = vmax.f32 %v475_v41, 0.0  ;;  %v407_v37 = vpop.f32.mrf.mxu3 }
 0x189   :  { %v714_v49 = vmax.f32 %v635_v42, 0.0 }
 0x18c   :  { %v476_v3 = vpop.f32.mrf.mxu1 }
 0x18d   :  { %v477_v43 = vadd.f32 %v476_v3, %v388_v48 }
 0x18e   :  { %v636_v44 = vpop.f32.mrf.mxu2 }
 0x18f   :  { %v528_v46 = vmax.f32 %v477_v43, 0.0  ;;  %v637_v47 = vadd.f32 %v1648_v40, %v636_v44  ;;  %v406_v44 = vadd.f32 %v1606_v34, %v405_v26 }
 0x191   :  { %v550_v50 = vpack.c.bf16 %v528_v46, %v527_v45  ;;  %v715_v51 = vmax.f32 %v637_v47, 0.0  ;;  %v410_v45 = vpop.f32.mrf.mxu3  ;;  %v408_v46 = vadd.f32 %v1606_v34, %v407_v37 }
 0x193   :  { %678 = vmatmul.bf16.gmra.mxu2 %v550_v50  ;;  %v746_v21 = vpack.c.bf16 %v715_v51, %v714_v49 }
 0x194   :  { %v479_v52 = vpop.f32.mrf.mxu1 }
 0x195   :  { %872 = vmatmul.bf16.vlgmr.msrb.gmra.mxu3 %v746_v21  ;;  %961 = vmatmul.bf16.vlgmr.msrb.gmra.mxu0 %v746_v21  ;;  %v480_v56 = vadd.f32 %v479_v52, %v391_v38 }
 0x196   :  { %v639_v54 = vpop.f32.mrf.mxu2 }
 0x197   :  { %v640_v58 = vadd.f32 %v1648_v40, %v639_v54  ;;  %v529_v60 = vmax.f32 %v480_v56, 0.0 }
 0x199   :  { %v716_v22 = vmax.f32 %v640_v58, 0.0 }
 0x19c   :  { %v481_v57 = vpop.f32.mrf.mxu1 }
 0x19d   :  { %v482_v59 = vadd.f32 %v481_v57, %v393_v55 }
 0x19e   :  { %v641_v20 = vpop.f32.mrf.mxu2 }
 0x19f   :  { %v530_v61 = vmax.f32 %v482_v59, 0.0  ;;  %v642_v62 = vadd.f32 %v1648_v40, %v641_v20  ;;  %v412_v59 = vpop.f32.mrf.mxu3 }
 0x1a1   :  { %v551_v63 = vpack.c.bf16 %v530_v61, %v529_v60  ;;  %v717_v1 = vmax.f32 %v642_v62, 0.0  ;;  %v411_v61 = vadd.f32 %v1606_v34, %v410_v45  ;;  %v413_v62 = vadd.f32 %v1606_v34, %v412_v59 }
 0x1a3   :  { %683 = vmatmul.bf16.gmra.mxu2 %v551_v63  ;;  %v747_v0 = vpack.c.bf16 %v717_v1, %v716_v22 }
 0x1a4   :  { %v484_v4 = vpop.f32.mrf.mxu1 }
 0x1a5   :  { %877 = vmatmul.bf16.gmra.mxu3 %v747_v0  ;;  %966 = vmatmul.bf16.gmra.mxu0 %v747_v0  ;;  %v485_v7 = vadd.f32 %v484_v4, %v396_v6 }
 0x1a6   :  { %v644_v53 = vpop.f32.mrf.mxu2 }
 0x1a7   :  { %v645_v11 = vadd.f32 %v1648_v40, %v644_v53  ;;  %v531_v14 = vmax.f32 %v485_v7, 0.0  ;;  %v415_v0 = vpop.f32.mrf.mxu3 }
 0x1a9   :  { %v718_v18 = vmax.f32 %v645_v11, 0.0 }
 0x1ac   :  { %v486_v8 = vpop.f32.mrf.mxu1 }
 0x1ad   :  { %v487_v12 = vadd.f32 %v486_v8, %v398_v5 }
 0x1ae   :  { %v646_v13 = vpop.f32.mrf.mxu2 }
 0x1af   :  { %v532_v16 = vmax.f32 %v487_v12, 0.0  ;;  %v647_v17 = vadd.f32 %v1648_v40, %v646_v13 }
 0x1b1   :  { %v552_v19 = vpack.c.bf16 %v532_v16, %v531_v14  ;;  %v719_v23 = vmax.f32 %v647_v17, 0.0  ;;  %v416_v14 = vadd.f32 %v1606_v34, %v415_v0  ;;  %v417_v16 = vpop.f32.mrf.mxu3 }
 0x1b2   :  { %v418_v17 = vadd.f32 %v1606_v34, %v417_v16 }
 0x1b3   :  { %688 = vmatmul.bf16.gmra.mxu2 %v552_v19  ;;  %v748_v27 = vpack.c.bf16 %v719_v23, %v718_v18 }
 0x1b4   :  { %v489_v24 = vpop.f32.mrf.mxu1 }
 0x1b5   :  { %882 = vmatmul.bf16.gmra.mxu3 %v748_v27  ;;  %971 = vmatmul.bf16.gmra.mxu0 %v748_v27  ;;  %v490_v30 = vadd.f32 %v489_v24, %v401_v28 }
 0x1b6   :  { %v649_v25 = vpop.f32.mrf.mxu2 }
 0x1b7   :  { %v650_v32 = vadd.f32 %v1648_v40, %v649_v25  ;;  %v533_v35 = vmax.f32 %v490_v30, 0.0 }
 0x1b9   :  { %v720_v39 = vmax.f32 %v650_v32, 0.0 }
 0x1bc   :  { %v491_v31 = vpop.f32.mrf.mxu1 }
 0x1bd   :  { %v492_v33 = vadd.f32 %v491_v31, %v403_v29 }
 0x1be   :  { %v651_v10 = vpop.f32.mrf.mxu2 }
 0x1bf   :  { %v534_v36 = vmax.f32 %v492_v33, 0.0  ;;  %v652_v15 = vadd.f32 %v1648_v40, %v651_v10 }
 0x1c1   :  { %v553_v48 = vpack.c.bf16 %v534_v36, %v533_v35  ;;  %v721_v41 = vmax.f32 %v652_v15, 0.0 }
 0x1c3   :  { %693 = vmatmul.bf16.gmra.mxu2 %v553_v48  ;;  %v749_v3 = vpack.c.bf16 %v721_v41, %v720_v39  ;;  %v778_v48 = vld [vmem:[%s1780_s6] sm:$0x3]  ;;  %s1528_s6 = smov [#allocation11]  }
 0x1c4   :  { %v494_v42 = vpop.f32.mrf.mxu1  ;;  %s1110_s30 = sshll.u32 %s1528_s6, 4  ;;  %s1111_s30 = int_to_ptr.vmem [resolvable:$true] %s1110_s30 }
 0x1c5   :  { %887 = vmatmul.bf16.gmra.mxu3 %v749_v3  ;;  %976 = vmatmul.bf16.gmra.mxu0 %v749_v3  ;;  %v495_v47 = vadd.f32 %v494_v42, %v406_v44 }
 0x1c6   :  { %v654_v43 = vpop.f32.mrf.mxu2 }
 0x1c7   :  { %v655_v50 = vadd.f32 %v1648_v40, %v654_v43  ;;  %v535_v52 = vmax.f32 %v495_v47, 0.0  ;;  %v1686_v43 = vperm.slane %v778_v48, 1 }
 0x1c9   :  { %v722_v55 = vmax.f32 %v655_v50, 0.0  ;;  %v1689_v50 = vperm.slane %v778_v48, 0 }
 0x1cc   :  { %v496_v49 = vpop.f32.mrf.mxu1 }
 0x1cd   :  { %v497_v51 = vadd.f32 %v496_v49, %v408_v46 }
 0x1ce   :  { %v656_v21 = vpop.f32.mrf.mxu2 }
 0x1cf   :  { %v536_v54 = vmax.f32 %v497_v51, 0.0  ;;  %v657_v38 = vadd.f32 %v1648_v40, %v656_v21 }
 0x1d1   :  { %v554_v56 = vpack.c.bf16 %v536_v54, %v535_v52  ;;  %v723_v57 = vmax.f32 %v657_v38, 0.0 }
 0x1d3   :  { %698 = vmatmul.bf16.gmra.mxu2 %v554_v56  ;;  %v750_v58 = vpack.c.bf16 %v723_v57, %v722_v55 }
 0x1d4   :  { %v499_v20 = vpop.f32.mrf.mxu1 }
 0x1d5   :  { %892 = vmatmul.bf16.gmra.mxu3 %v750_v58  ;;  %981 = vmatmul.bf16.gmra.mxu0 %v750_v58  ;;  %v500_v22 = vadd.f32 %v499_v20, %v411_v61 }
 0x1d6   :  { %v659_v60 = vpop.f32.mrf.mxu2 }
 0x1d7   :  { %v660_v1 = vadd.f32 %v1648_v40, %v659_v60  ;;  %v537_v53 = vmax.f32 %v500_v22, 0.0 }
 0x1d9   :  { %v724_v7 = vmax.f32 %v660_v1, 0.0 }
 0x1dc   :  { %v501_v63 = vpop.f32.mrf.mxu1 }
 0x1dd   :  { %v502_v2 = vadd.f32 %v501_v63, %v413_v62 }
 0x1de   :  { %v661_v4 = vpop.f32.mrf.mxu2 }
 0x1df   :  { %v538_v6 = vmax.f32 %v502_v2, 0.0  ;;  %v662_v5 = vadd.f32 %v1648_v40, %v661_v4 }
 0x1e1   :  { %v555_v8 = vpack.c.bf16 %v538_v6, %v537_v53  ;;  %v725_v9 = vmax.f32 %v662_v5, 0.0 }
 0x1e3   :  { %703 = vmatmul.bf16.gmra.mxu2 %v555_v8  ;;  %v751_v11 = vpack.c.bf16 %v725_v9, %v724_v7 }
 0x1e4   :  { %v504_v12 = vpop.f32.mrf.mxu1 }
 0x1e5   :  { %897 = vmatmul.bf16.gmra.mxu3 %v751_v11  ;;  %986 = vmatmul.bf16.gmra.mxu0 %v751_v11  ;;  %v505_v18 = vadd.f32 %v504_v12, %v416_v14 }
 0x1e6   :  { %v664_v13 = vpop.f32.mrf.mxu2 }
 0x1e7   :  { %v665_v23 = vadd.f32 %v1648_v40, %v664_v13  ;;  %v539_v25 = vmax.f32 %v505_v18, 0.0 }
 0x1e9   :  { %v726_v29 = vmax.f32 %v665_v23, 0.0 }
 0x1ec   :  { %v506_v19 = vpop.f32.mrf.mxu1 }
 0x1ed   :  { %v507_v27 = vadd.f32 %v506_v19, %v418_v17 }
 0x1ee   :  { %v666_v24 = vpop.f32.mrf.mxu2 }
 0x1ef   :  { %v540_v26 = vmax.f32 %v507_v27, 0.0  ;;  %v667_v28 = vadd.f32 %v1648_v40, %v666_v24 }
 0x1f1   :  { %v556_v30 = vpack.c.bf16 %v540_v26, %v539_v25  ;;  %v727_v31 = vmax.f32 %v667_v28, 0.0 }
 0x1f3   :  { %708 = vmatmul.bf16.gmra.mxu2 %v556_v30  ;;  %v752_v32 = vpack.c.bf16 %v727_v31, %v726_v29 }
 0x1f5   :  { %902 = vmatmul.bf16.gmra.mxu3 %v752_v32  ;;  %991 = vmatmul.bf16.gmra.mxu0 %v752_v32 }
 0x1f6   :  { %v669_v33 = vpop.f32.mrf.mxu2 }
 0x1f7   :  { %v670_v34 = vadd.f32 %v1648_v40, %v669_v33 }
 0x1f9   :  { %v728_v36 = vmax.f32 %v670_v34, 0.0 }
 0x1fe   :  { %v671_v10 = vpop.f32.mrf.mxu2 }
 0x1ff   :  { %v672_v35 = vadd.f32 %v1648_v40, %v671_v10 }
 0x201   :  { %v729_v15 = vmax.f32 %v672_v35, 0.0 }
 0x203   :  { %v753_v37 = vpack.c.bf16 %v729_v15, %v728_v36 }
 0x205   :  { %907 = vmatmul.bf16.gmra.mxu3 %v753_v37  ;;  %996 = vmatmul.bf16.gmra.mxu0 %v753_v37 }
 0x206   :  { %v674_v39 = vpop.f32.mrf.mxu2 }
 0x207   :  { %v675_v41 = vadd.f32 %v1648_v40, %v674_v39 }
 0x209   :  { %v730_v44 = vmax.f32 %v675_v41, 0.0 }
 0x20e   :  { %v676_v3 = vpop.f32.mrf.mxu2 }
 0x20f   :  { %v677_v42 = vadd.f32 %v1648_v40, %v676_v3 }
 0x211   :  { %v731_v45 = vmax.f32 %v677_v42, 0.0 }
 0x212   :  { %v962_v46 = vpop.f32.mrf.mxu0 }
 0x213   :  { %v754_v47 = vpack.c.bf16 %v731_v45, %v730_v44  ;;  %v963_v49 = vadd.f32 %v962_v46, %v1686_v43 }
 0x215   :  { %1043 = vst [vmem:[#allocation11 + $0x8] sm:$0xff] %v963_v49  ;;  %912 = vmatmul.bf16.gmra.mxu3 %v754_v47  ;;  %1001 = vmatmul.bf16.gmra.mxu0 %v754_v47 }
 0x216   :  { %v679_v51 = vpop.f32.mrf.mxu2 }
 0x217   :  { %v680_v55 = vadd.f32 %v1648_v40, %v679_v51 }
 0x218   :  { %v873_v21 = vpop.f32.mrf.mxu3 }
 0x219   :  { %v874_v52 = vadd.f32 %v873_v21, %v1689_v50  ;;  %v732_v59 = vmax.f32 %v680_v55, 0.0 }
 0x21a   :  { %v964_v54 = vpop.f32.mrf.mxu0 }
 0x21b   :  { %1042 = vst [vmem:[#allocation11] sm:$0xff] %v874_v52  ;;  %v965_v38 = vadd.f32 %v964_v54, %v1686_v43 }
 0x21d   :  { %1045 = vst [vmem:[#allocation11 + $0x18] sm:$0xff] %v965_v38 }
 0x21e   :  { %v681_v56 = vpop.f32.mrf.mxu2 }
 0x21f   :  { %v682_v57 = vadd.f32 %v1648_v40, %v681_v56 }
 0x220   :  { %v875_v58 = vpop.f32.mrf.mxu3 }
 0x221   :  { %v733_v20 = vmax.f32 %v682_v57, 0.0  ;;  %v876_v60 = vadd.f32 %v875_v58, %v1689_v50 }
 0x222   :  { %v967_v61 = vpop.f32.mrf.mxu0 }
 0x223   :  { %v755_v62 = vpack.c.bf16 %v733_v20, %v732_v59  ;;  %1044 = vst [vmem:[#allocation11 + $0x10] sm:$0xff] %v876_v60  ;;  %v968_v22 = vadd.f32 %v967_v61, %v1686_v43 }
 0x225   :  { %1047 = vst [vmem:[#allocation11 + $0x28] sm:$0xff] %v968_v22  ;;  %917 = vmatmul.bf16.gmra.mxu3 %v755_v62  ;;  %1006 = vmatmul.bf16.gmra.mxu0 %v755_v62 }
 0x226   :  { %v684_v63 = vpop.f32.mrf.mxu2 }
 0x227   :  { %v685_v53 = vadd.f32 %v1648_v40, %v684_v63 }
 0x228   :  { %v878_v1 = vpop.f32.mrf.mxu3 }
 0x229   :  { %v879_v2 = vadd.f32 %v878_v1, %v1689_v50  ;;  %v734_v8 = vmax.f32 %v685_v53, 0.0 }
 0x22a   :  { %v969_v0 = vpop.f32.mrf.mxu0 }
 0x22b   :  { %1046 = vst [vmem:[#allocation11 + $0x20] sm:$0xff] %v879_v2  ;;  %v970_v4 = vadd.f32 %v969_v0, %v1686_v43 }
 0x22d   :  { %1049 = vst [vmem:[#allocation11 + $0x38] sm:$0xff] %v970_v4 }
 0x22e   :  { %v686_v6 = vpop.f32.mrf.mxu2 }
 0x22f   :  { %v687_v5 = vadd.f32 %v1648_v40, %v686_v6 }
 0x230   :  { %v880_v7 = vpop.f32.mrf.mxu3 }
 0x231   :  { %v735_v9 = vmax.f32 %v687_v5, 0.0  ;;  %v881_v11 = vadd.f32 %v880_v7, %v1689_v50 }
 0x232   :  { %v972_v12 = vpop.f32.mrf.mxu0 }
 0x233   :  { %v756_v13 = vpack.c.bf16 %v735_v9, %v734_v8  ;;  %1048 = vst [vmem:[#allocation11 + $0x30] sm:$0xff] %v881_v11  ;;  %v973_v14 = vadd.f32 %v972_v12, %v1686_v43 }
 0x235   :  { %1051 = vst [vmem:[#allocation11 + $0x48] sm:$0xff] %v973_v14  ;;  %922 = vmatmul.bf16.gmra.mxu3 %v756_v13  ;;  %1011 = vmatmul.bf16.gmra.mxu0 %v756_v13 }
 0x236   :  { %v689_v16 = vpop.f32.mrf.mxu2 }
 0x237   :  { %v690_v27 = vadd.f32 %v1648_v40, %v689_v16 }
 0x238   :  { %v883_v17 = vpop.f32.mrf.mxu3 }
 0x239   :  { %v884_v18 = vadd.f32 %v883_v17, %v1689_v50  ;;  %v736_v28 = vmax.f32 %v690_v27, 0.0 }
 0x23a   :  { %v974_v19 = vpop.f32.mrf.mxu0 }
 0x23b   :  { %1050 = vst [vmem:[#allocation11 + $0x40] sm:$0xff] %v884_v18  ;;  %v975_v23 = vadd.f32 %v974_v19, %v1686_v43 }
 0x23d   :  { %1053 = vst [vmem:[#allocation11 + $0x58] sm:$0xff] %v975_v23 }
 0x23e   :  { %v691_v24 = vpop.f32.mrf.mxu2 }
 0x23f   :  { %v692_v25 = vadd.f32 %v1648_v40, %v691_v24 }
 0x240   :  { %v885_v26 = vpop.f32.mrf.mxu3 }
 0x241   :  { %v737_v29 = vmax.f32 %v692_v25, 0.0  ;;  %v886_v30 = vadd.f32 %v885_v26, %v1689_v50 }
 0x242   :  { %v977_v31 = vpop.f32.mrf.mxu0 }
 0x243   :  { %v757_v32 = vpack.c.bf16 %v737_v29, %v736_v28  ;;  %1052 = vst [vmem:[#allocation11 + $0x50] sm:$0xff] %v886_v30  ;;  %v978_v33 = vadd.f32 %v977_v31, %v1686_v43 }
 0x245   :  { %1055 = vst [vmem:[#allocation11 + $0x68] sm:$0xff] %v978_v33  ;;  %927 = vmatmul.bf16.gmra.mxu3 %v757_v32  ;;  %1016 = vmatmul.bf16.gmra.mxu0 %v757_v32 }
 0x246   :  { %v694_v34 = vpop.f32.mrf.mxu2 }
 0x247   :  { %v695_v37 = vadd.f32 %v1648_v40, %v694_v34 }
 0x248   :  { %v888_v10 = vpop.f32.mrf.mxu3 }
 0x249   :  { %v889_v35 = vadd.f32 %v888_v10, %v1689_v50  ;;  %v738_v3 = vmax.f32 %v695_v37, 0.0 }
 0x24a   :  { %v979_v36 = vpop.f32.mrf.mxu0 }
 0x24b   :  { %1054 = vst [vmem:[#allocation11 + $0x60] sm:$0xff] %v889_v35  ;;  %v980_v15 = vadd.f32 %v979_v36, %v1686_v43 }
 0x24d   :  { %1057 = vst [vmem:[#allocation11 + $0x78] sm:$0xff] %v980_v15 }
 0x24e   :  { %v696_v39 = vpop.f32.mrf.mxu2 }
 0x24f   :  { %v697_v48 = vadd.f32 %v1648_v40, %v696_v39 }
 0x250   :  { %v890_v41 = vpop.f32.mrf.mxu3 }
 0x251   :  { %v739_v42 = vmax.f32 %v697_v48, 0.0  ;;  %v891_v44 = vadd.f32 %v890_v41, %v1689_v50 }
 0x252   :  { %v982_v45 = vpop.f32.mrf.mxu0 }
 0x253   :  { %v758_v46 = vpack.c.bf16 %v739_v42, %v738_v3  ;;  %1056 = vst [vmem:[#allocation11 + $0x70] sm:$0xff] %v891_v44  ;;  %v983_v47 = vadd.f32 %v982_v45, %v1686_v43 }
 0x255   :  { %1059 = vst [vmem:[#allocation11 + $0x88] sm:$0xff] %v983_v47  ;;  %932 = vmatmul.bf16.gmra.mxu3 %v758_v46  ;;  %1021 = vmatmul.bf16.gmra.mxu0 %v758_v46 }
 0x256   :  { %v699_v49 = vpop.f32.mrf.mxu2 }
 0x257   :  { %v700_v38 = vadd.f32 %v1648_v40, %v699_v49 }
 0x258   :  { %v893_v51 = vpop.f32.mrf.mxu3 }
 0x259   :  { %v894_v21 = vadd.f32 %v893_v51, %v1689_v50  ;;  %v740_v58 = vmax.f32 %v700_v38, 0.0 }
 0x25a   :  { %v984_v52 = vpop.f32.mrf.mxu0 }
 0x25b   :  { %1058 = vst [vmem:[#allocation11 + $0x80] sm:$0xff] %v894_v21  ;;  %v985_v54 = vadd.f32 %v984_v52, %v1686_v43 }
 0x25d   :  { %1061 = vst [vmem:[#allocation11 + $0x98] sm:$0xff] %v985_v54 }
 0x25e   :  { %v701_v55 = vpop.f32.mrf.mxu2 }
 0x25f   :  { %v702_v56 = vadd.f32 %v1648_v40, %v701_v55 }
 0x260   :  { %v895_v57 = vpop.f32.mrf.mxu3 }
 0x261   :  { %v741_v59 = vmax.f32 %v702_v56, 0.0  ;;  %v896_v20 = vadd.f32 %v895_v57, %v1689_v50 }
 0x262   :  { %v987_v60 = vpop.f32.mrf.mxu0 }
 0x263   :  { %v759_v61 = vpack.c.bf16 %v741_v59, %v740_v58  ;;  %1060 = vst [vmem:[#allocation11 + $0x90] sm:$0xff] %v896_v20  ;;  %v988_v62 = vadd.f32 %v987_v60, %v1686_v43 }
 0x265   :  { %1063 = vst [vmem:[#allocation11 + $0xa8] sm:$0xff] %v988_v62  ;;  %937 = vmatmul.bf16.gmra.mxu3 %v759_v61  ;;  %1026 = vmatmul.bf16.gmra.mxu0 %v759_v61 }
 0x266   :  { %v704_v22 = vpop.f32.mrf.mxu2 }
 0x267   :  { %v705_v4 = vadd.f32 %v1648_v40, %v704_v22 }
 0x268   :  { %v898_v63 = vpop.f32.mrf.mxu3 }
 0x269   :  { %v899_v1 = vadd.f32 %v898_v63, %v1689_v50  ;;  %v742_v7 = vmax.f32 %v705_v4, 0.0 }
 0x26a   :  { %v989_v2 = vpop.f32.mrf.mxu0 }
 0x26b   :  { %1062 = vst [vmem:[#allocation11 + $0xa0] sm:$0xff] %v899_v1  ;;  %v990_v0 = vadd.f32 %v989_v2, %v1686_v43 }
 0x26d   :  { %1065 = vst [vmem:[#allocation11 + $0xb8] sm:$0xff] %v990_v0 }
 0x26e   :  { %v706_v53 = vpop.f32.mrf.mxu2 }
 0x26f   :  { %v707_v6 = vadd.f32 %v1648_v40, %v706_v53 }
 0x270   :  { %v900_v5 = vpop.f32.mrf.mxu3 }
 0x271   :  { %v743_v8 = vmax.f32 %v707_v6, 0.0  ;;  %v901_v9 = vadd.f32 %v900_v5, %v1689_v50 }
 0x272   :  { %v992_v11 = vpop.f32.mrf.mxu0 }
 0x273   :  { %v760_v12 = vpack.c.bf16 %v743_v8, %v742_v7  ;;  %1064 = vst [vmem:[#allocation11 + $0xb0] sm:$0xff] %v901_v9  ;;  %v993_v13 = vadd.f32 %v992_v11, %v1686_v43 }
 0x275   :  { %1067 = vst [vmem:[#allocation11 + $0xc8] sm:$0xff] %v993_v13  ;;  %942 = vmatmul.bf16.gmra.mxu3 %v760_v12  ;;  %1031 = vmatmul.bf16.gmra.mxu0 %v760_v12 }
 0x276   :  { %v709_v14 = vpop.f32.mrf.mxu2 }
 0x277   :  { %v710_v23 = vadd.f32 %v1648_v40, %v709_v14 }
 0x278   :  { %v903_v16 = vpop.f32.mrf.mxu3 }
 0x279   :  { %v904_v17 = vadd.f32 %v903_v16, %v1689_v50  ;;  %v744_v26 = vmax.f32 %v710_v23, 0.0 }
 0x27a   :  { %v994_v18 = vpop.f32.mrf.mxu0 }
 0x27b   :  { %1066 = vst [vmem:[#allocation11 + $0xc0] sm:$0xff] %v904_v17  ;;  %v995_v19 = vadd.f32 %v994_v18, %v1686_v43 }
 0x27d   :  { %1069 = vst [vmem:[#allocation11 + $0xd8] sm:$0xff] %v995_v19 }
 0x27e   :  { %v711_v27 = vpop.f32.mrf.mxu2 }
 0x27f   :  { %v712_v24 = vadd.f32 %v1648_v40, %v711_v27 }
 0x280   :  { %v905_v25 = vpop.f32.mrf.mxu3 }
 0x281   :  { %v745_v28 = vmax.f32 %v712_v24, 0.0  ;;  %v906_v29 = vadd.f32 %v905_v25, %v1689_v50 }
 0x282   :  { %v997_v30 = vpop.f32.mrf.mxu0 }
 0x283   :  { %v761_v31 = vpack.c.bf16 %v745_v28, %v744_v26  ;;  %1068 = vst [vmem:[#allocation11 + $0xd0] sm:$0xff] %v906_v29  ;;  %v998_v32 = vadd.f32 %v997_v30, %v1686_v43 }
 0x285   :  { %1071 = vst [vmem:[#allocation11 + $0xe8] sm:$0xff] %v998_v32  ;;  %947 = vmatmul.bf16.gmra.mxu3 %v761_v31  ;;  %1036 = vmatmul.bf16.gmra.mxu0 %v761_v31 }
 0x288   :  { %v908_v33 = vpop.f32.mrf.mxu3 }
 0x289   :  { %v909_v34 = vadd.f32 %v908_v33, %v1689_v50 }
 0x28a   :  { %v999_v10 = vpop.f32.mrf.mxu0 }
 0x28b   :  { %1070 = vst [vmem:[#allocation11 + $0xe0] sm:$0xff] %v909_v34  ;;  %v1000_v40 = vadd.f32 %v999_v10, %v1686_v43 }
 0x28d   :  { %1073 = vst [vmem:[#allocation11 + $0xf8] sm:$0xff] %v1000_v40 }
 0x290   :  { %v910_v35 = vpop.f32.mrf.mxu3 }
 0x291   :  { %v911_v36 = vadd.f32 %v910_v35, %v1689_v50 }
 0x292   :  { %v1002_v15 = vpop.f32.mrf.mxu0 }
 0x293   :  { %1072 = vst [vmem:[#allocation11 + $0xf0] sm:$0xff] %v911_v36  ;;  %v1003_v37 = vadd.f32 %v1002_v15, %v1686_v43 }
 0x295   :  { %1075 = vst [vmem:[#allocation11 + $0x108] sm:$0xff] %v1003_v37 }
 0x298   :  { %v913_v39 = vpop.f32.mrf.mxu3 }
 0x299   :  { %v914_v48 = vadd.f32 %v913_v39, %v1689_v50 }
 0x29a   :  { %v1004_v41 = vpop.f32.mrf.mxu0 }
 0x29b   :  { %1074 = vst [vmem:[#allocation11 + $0x100] sm:$0xff] %v914_v48  ;;  %v1005_v3 = vadd.f32 %v1004_v41, %v1686_v43 }
 0x29d   :  { %1077 = vst [vmem:[#allocation11 + $0x118] sm:$0xff] %v1005_v3 }
 0x2a0   :  { %v915_v42 = vpop.f32.mrf.mxu3 }
 0x2a1   :  { %v916_v44 = vadd.f32 %v915_v42, %v1689_v50 }
 0x2a2   :  { %v1007_v45 = vpop.f32.mrf.mxu0 }
 0x2a3   :  { %1076 = vst [vmem:[#allocation11 + $0x110] sm:$0xff] %v916_v44  ;;  %v1008_v46 = vadd.f32 %v1007_v45, %v1686_v43 }
 0x2a5   :  { %1079 = vst [vmem:[#allocation11 + $0x128] sm:$0xff] %v1008_v46 }
 0x2a8   :  { %v918_v47 = vpop.f32.mrf.mxu3 }
 0x2a9   :  { %v919_v49 = vadd.f32 %v918_v47, %v1689_v50 }
 0x2aa   :  { %v1009_v51 = vpop.f32.mrf.mxu0 }
 0x2ab   :  { %1078 = vst [vmem:[#allocation11 + $0x120] sm:$0xff] %v919_v49  ;;  %v1010_v21 = vadd.f32 %v1009_v51, %v1686_v43 }
 0x2ad   :  { %1081 = vst [vmem:[#allocation11 + $0x138] sm:$0xff] %v1010_v21 }
 0x2b0   :  { %v920_v52 = vpop.f32.mrf.mxu3 }
 0x2b1   :  { %v921_v54 = vadd.f32 %v920_v52, %v1689_v50 }
 0x2b2   :  { %v1012_v38 = vpop.f32.mrf.mxu0 }
 0x2b3   :  { %1080 = vst [vmem:[#allocation11 + $0x130] sm:$0xff] %v921_v54  ;;  %v1013_v55 = vadd.f32 %v1012_v38, %v1686_v43 }
 0x2b5   :  { %1083 = vst [vmem:[#allocation11 + $0x148] sm:$0xff] %v1013_v55 }
 0x2b8   :  { %v923_v56 = vpop.f32.mrf.mxu3 }
 0x2b9   :  { %v924_v57 = vadd.f32 %v923_v56, %v1689_v50 }
 0x2ba   :  { %v1014_v58 = vpop.f32.mrf.mxu0 }
 0x2bb   :  { %1082 = vst [vmem:[#allocation11 + $0x140] sm:$0xff] %v924_v57  ;;  %v1015_v59 = vadd.f32 %v1014_v58, %v1686_v43 }
 0x2bd   :  { %1085 = vst [vmem:[#allocation11 + $0x158] sm:$0xff] %v1015_v59 }
 0x2c0   :  { %v925_v20 = vpop.f32.mrf.mxu3 }
 0x2c1   :  { %v926_v60 = vadd.f32 %v925_v20, %v1689_v50 }
 0x2c2   :  { %v1017_v61 = vpop.f32.mrf.mxu0 }
 0x2c3   :  { %1084 = vst [vmem:[#allocation11 + $0x150] sm:$0xff] %v926_v60  ;;  %v1018_v62 = vadd.f32 %v1017_v61, %v1686_v43 }
 0x2c5   :  { %1087 = vst [vmem:[#allocation11 + $0x168] sm:$0xff] %v1018_v62 }
 0x2c8   :  { %v928_v22 = vpop.f32.mrf.mxu3 }
 0x2c9   :  { %v929_v63 = vadd.f32 %v928_v22, %v1689_v50 }
 0x2ca   :  { %v1019_v1 = vpop.f32.mrf.mxu0 }
 0x2cb   :  { %1086 = vst [vmem:[#allocation11 + $0x160] sm:$0xff] %v929_v63  ;;  %v1020_v2 = vadd.f32 %v1019_v1, %v1686_v43 }
 0x2cd   :  { %1089 = vst [vmem:[#allocation11 + $0x178] sm:$0xff] %v1020_v2 }
 0x2d0   :  { %v930_v0 = vpop.f32.mrf.mxu3 }
 0x2d1   :  { %v931_v4 = vadd.f32 %v930_v0, %v1689_v50 }
 0x2d2   :  { %v1022_v53 = vpop.f32.mrf.mxu0 }
 0x2d3   :  { %1088 = vst [vmem:[#allocation11 + $0x170] sm:$0xff] %v931_v4  ;;  %v1023_v6 = vadd.f32 %v1022_v53, %v1686_v43 }
 0x2d5   :  { %1091 = vst [vmem:[#allocation11 + $0x188] sm:$0xff] %v1023_v6 }
 0x2d8   :  { %v933_v5 = vpop.f32.mrf.mxu3 }
 0x2d9   :  { %v934_v7 = vadd.f32 %v933_v5, %v1689_v50 }
 0x2da   :  { %v1024_v8 = vpop.f32.mrf.mxu0 }
 0x2db   :  { %1090 = vst [vmem:[#allocation11 + $0x180] sm:$0xff] %v934_v7  ;;  %v1025_v9 = vadd.f32 %v1024_v8, %v1686_v43 }
 0x2dd   :  { %1093 = vst [vmem:[#allocation11 + $0x198] sm:$0xff] %v1025_v9 }
 0x2e0   :  { %v935_v11 = vpop.f32.mrf.mxu3 }
 0x2e1   :  { %v936_v12 = vadd.f32 %v935_v11, %v1689_v50 }
 0x2e2   :  { %v1027_v13 = vpop.f32.mrf.mxu0 }
 0x2e3   :  { %1092 = vst [vmem:[#allocation11 + $0x190] sm:$0xff] %v936_v12  ;;  %v1028_v14 = vadd.f32 %v1027_v13, %v1686_v43 }
 0x2e5   :  { %1095 = vst [vmem:[#allocation11 + $0x1a8] sm:$0xff] %v1028_v14 }
 0x2e8   :  { %v938_v16 = vpop.f32.mrf.mxu3 }
 0x2e9   :  { %v939_v17 = vadd.f32 %v938_v16, %v1689_v50 }
 0x2ea   :  { %v1029_v18 = vpop.f32.mrf.mxu0 }
 0x2eb   :  { %1094 = vst [vmem:[#allocation11 + $0x1a0] sm:$0xff] %v939_v17  ;;  %v1030_v19 = vadd.f32 %v1029_v18, %v1686_v43 }
 0x2ed   :  { %1097 = vst [vmem:[#allocation11 + $0x1b8] sm:$0xff] %v1030_v19 }
 0x2f0   :  { %v940_v23 = vpop.f32.mrf.mxu3 }
 0x2f1   :  { %v941_v27 = vadd.f32 %v940_v23, %v1689_v50 }
 0x2f2   :  { %v1032_v24 = vpop.f32.mrf.mxu0 }
 0x2f3   :  { %1096 = vst [vmem:[#allocation11 + $0x1b0] sm:$0xff] %v941_v27  ;;  %v1033_v25 = vadd.f32 %v1032_v24, %v1686_v43 }
 0x2f5   :  { %1099 = vst [vmem:[#allocation11 + $0x1c8] sm:$0xff] %v1033_v25 }
 0x2f8   :  { %v943_v26 = vpop.f32.mrf.mxu3 }
 0x2f9   :  { %v944_v28 = vadd.f32 %v943_v26, %v1689_v50 }
 0x2fa   :  { %v1034_v29 = vpop.f32.mrf.mxu0 }
 0x2fb   :  { %1098 = vst [vmem:[#allocation11 + $0x1c0] sm:$0xff] %v944_v28  ;;  %v1035_v30 = vadd.f32 %v1034_v29, %v1686_v43 }
 0x2fd   :  { %1101 = vst [vmem:[#allocation11 + $0x1d8] sm:$0xff] %v1035_v30 }
 0x300   :  { %v945_v31 = vpop.f32.mrf.mxu3 }
 0x301   :  { %v946_v32 = vadd.f32 %v945_v31, %v1689_v50 }
 0x302   :  { %v1037_v33 = vpop.f32.mrf.mxu0 }
 0x303   :  { %1100 = vst [vmem:[#allocation11 + $0x1d0] sm:$0xff] %v946_v32  ;;  %v1038_v34 = vadd.f32 %v1037_v33, %v1686_v43 }
 0x305   :  { %1103 = vst [vmem:[#allocation11 + $0x1e8] sm:$0xff] %v1038_v34 }
 0x308   :  { %v948_v10 = vpop.f32.mrf.mxu3 }
 0x309   :  { %v949_v40 = vadd.f32 %v948_v10, %v1689_v50 }
 0x30a   :  { %v1039_v35 = vpop.f32.mrf.mxu0 }
 0x30b   :  { %1102 = vst [vmem:[#allocation11 + $0x1e0] sm:$0xff] %v949_v40  ;;  %v1040_v36 = vadd.f32 %v1039_v35, %v1686_v43 }
 0x30d   :  { %1105 = vst [vmem:[#allocation11 + $0x1f8] sm:$0xff] %v1040_v36 }
 0x310   :  { %v950_v15 = vpop.f32.mrf.mxu3 }
 0x311   :  { %v951_v37 = vadd.f32 %v950_v15, %v1689_v50 }
 0x313   :  { %1104 = vst [vmem:[#allocation11 + $0x1f0] sm:$0xff] %v951_v37 }
 0x314   :  { %1118 = dma.vmem_to_hbm [thread:$0]  %s1111_s30, 8192, %s1113_s10, [#allocation4], %s1522_s19, %s1522_s19, %s1523_s20  }
 0x315   :  { %1515 = dma.done.wait [#allocation4], 8192  }
 0x316   :  { %1516 = vsyncadd [#allocation4], 4294959104 }
 0x317   :  { %1123 = vsyncpa [#allocation3], 1 }
 0x318   :  { %1124 = vsyncpa [#allocation6], 1 }
 0x319   :  { %1125 = vsyncpa [#allocation9], 1 }
 0x31a   :  { %1126 = vsyncpa [#allocation4], 1 }

</bundles_post_ra>
